<compile_context>
chip_gen: v7x
topology: tpu7x:2x2x1
jax: 0.10.0
libtpu: 0.0.40
codegen_flags: <defaults>
</compile_context>

<pallas_src>
import functools

import jax
import jax.numpy as jnp
from jax.experimental import pallas as pl
from jax.experimental.pallas import tpu as pltpu


# ----------------------------- glue: im2col (plain JAX) -----------------------------
def _im2col_3x3_same(x):
    """x: [B, C, H, W] -> patches [B*H*W, C*9], matching nn.Conv2d(k=3, stride=1, pad=1)."""
    B, C, H, W = x.shape
    xp = jnp.pad(x, ((0, 0), (0, 0), (1, 1), (1, 1)))
    cols = []
    for kh in range(3):
        for kw in range(3):
            cols.append(xp[:, :, kh:kh + H, kw:kw + W])     # [B, C, H, W]
    p = jnp.stack(cols, axis=2)                             # [B, C, 9, H, W]
    p = p.reshape(B, C * 9, H * W)                          # flat idx = ci*9 + kh*3 + kw
    p = p.transpose(0, 2, 1).reshape(B * H * W, C * 9)      # [B*HW, C*9]
    return p


# ----------------------------------- Pallas kernel ----------------------------------
def _moe_kernel(patches_ref, wc_ref, bc_ref, wg_ref, bg_ref, efw_ref, efb_ref,
                out_ref, pooled_ref, *, B, HW, GHID, EHID, E):
    b = pl.program_id(0)

    # ---- fused conv-as-matmul for the gate backbone + all E experts (one wide MXU push) ----
    patches = patches_ref[...]                                         # [HW, C*9]  bf16
    h = jnp.dot(patches, wc_ref[...], preferred_element_type=jnp.float32)
    h = jnp.maximum(h + bc_ref[...], 0.0)                              # [HW, NPACK] f32

    # ---- global average pool: sublane-axis reduce (XLU), no selector matmul ----
    pooled_ref[pl.ds(b, 1), :] = jnp.sum(h, axis=0, keepdims=True) * (1.0 / HW)

    # ---- tiny gate / FC / gate-weighted sum, once, after the last batch tile ----
    @pl.when(b == B - 1)
    def _():
        pooled = pooled_ref[...]                                       # [B, NPACK] f32
        pg = pooled[:, :GHID]                                          # gate GAP features
        # folded gate FC + proj_to_experts, then softmax over experts
        scores = jnp.dot(pg, wg_ref[...], preferred_element_type=jnp.float32) + bg_ref[...]
        scores = scores - jnp.max(scores, axis=1, keepdims=True)
        ex = jnp.exp(scores)
        gate = ex / jnp.sum(ex, axis=1, keepdims=True)                 # [B, E]

        acc = jnp.zeros(out_ref.shape, out_ref.dtype)
        for e in range(E):                                             # E is small & static
            pe = pooled[:, GHID + e * EHID: GHID + (e + 1) * EHID]     # [B, EHID]
            oe = jnp.dot(pe, efw_ref[e], preferred_element_type=jnp.float32) + efb_ref[e]
            acc = acc + gate[:, e:e + 1] * oe
        out_ref[...] = acc


# ------------------------------------- wrapper ---------------------------------------
def moe_cnn_forward(x, params):
    """x: [B, C, H, W] float32 (NCHW, like PyTorch).  Returns [B, num_classes]."""
    B, C, H, W = x.shape
    HW = H * W
    P = C * 9

    gc_w, gc_b, gf_w, gf_b, pj_w, pj_b, ec_w, ec_b, ef_w, ef_b = params
    E = ec_w.shape[0]
    GHID = gc_w.shape[1]
    EHID = ec_w.shape[2]
    NCLS = ef_w.shape[2]

    # ---- pack gate + expert conv weights along the output (lane) dim ----
    n_used = GHID + E * EHID
    NPACK = max(128, ((n_used + 127) // 128) * 128)    # =256 here -> fills a 256-wide MXU pass
    wc = jnp.zeros((P, NPACK), jnp.float32)
    wc = wc.at[:, :GHID].set(gc_w)
    wc = wc.at[:, GHID:n_used].set(ec_w.transpose(1, 0, 2).reshape(P, E * EHID))
    bc = jnp.zeros((1, NPACK), jnp.float32)
    bc = bc.at[:, :GHID].set(gc_b)
    bc = bc.at[:, GHID:n_used].set(ec_b.transpose(1, 0, 2).reshape(1, E * EHID))

    # ---- fold gate FC (GHID->10) with proj_to_experts (10->E) offline ----
    wg = gf_w @ pj_w                                    # [GHID, E]
    bg = gf_b @ pj_w + pj_b                             # [1, E]

    # ---- im2col + bf16 cast (halves DMA bytes / VMEM residency; accumulation stays f32) ----
    # TODO(synk): build the 3x3 taps in-kernel from a [tile, C, H, W] slice to drop the 9x
    #             im2col HBM expansion entirely.
    patches = _im2col_3x3_same(x).astype(jnp.bfloat16)  # [B*HW, C*9]
    wc = wc.astype(jnp.bfloat16)

    kernel = functools.partial(_moe_kernel, B=B, HW=HW, GHID=GHID, EHID=EHID, E=E)

    flops = 2 * B * HW * P * NPACK + 2 * B * GHID * E + 2 * B * E * EHID * NCLS
    bytes_accessed = (patches.size * 2 + wc.size * 2
                      + 4 * (bc.size + wg.size + bg.size + ef_w.size + ef_b.size + B * NCLS))
    cost = pl.CostEstimate(flops=flops, transcendentals=B * E, bytes_accessed=bytes_accessed)

    # One batch element (= HW rows of the patch matrix) per grid step; the pooled scratch and
    # the resident output block span the whole grid, so the axis must stay "arbitrary".
    grid = (B,)
    return pl.pallas_call(
        kernel,
        out_shape=jax.ShapeDtypeStruct((B, NCLS), jnp.float32),
        grid_spec=pltpu.PrefetchScalarGridSpec(
            num_scalar_prefetch=0,
            grid=grid,
            in_specs=[
                pl.BlockSpec((HW, P), lambda b: (b, 0)),            # patches: tiled by batch
                pl.BlockSpec((P, NPACK), lambda b: (0, 0)),         # packed conv weight (bf16)
                pl.BlockSpec((1, NPACK), lambda b: (0, 0)),         # packed conv bias   (f32)
                pl.BlockSpec((GHID, E), lambda b: (0, 0)),          # folded gate weight
                pl.BlockSpec((1, E), lambda b: (0, 0)),             # folded gate bias
                pl.BlockSpec((E, EHID, NCLS), lambda b: (0, 0, 0)), # expert FC weights
                pl.BlockSpec((E, 1, NCLS), lambda b: (0, 0, 0)),    # expert FC biases
            ],
            out_specs=pl.BlockSpec((B, NCLS), lambda b: (0, 0)),
            scratch_shapes=[pltpu.VMEM((B, NPACK), jnp.float32)],   # per-batch pooled features
        ),
        compiler_params=pltpu.CompilerParams(
            dimension_semantics=("arbitrary",),
            vmem_limit_bytes=32 * 1024 * 1024,
        ),
        cost_estimate=cost,
    )(patches, wc, bc, wg, bg, ef_w, ef_b)


# -------------------------- deterministic parameter setup ----------------------------
def init_params(key, C, E, GHID, EHID, NCLS):
    P = C * 9
    ks = jax.random.split(key, 10)

    def u(k, shape, fan_in):
        return jax.random.uniform(k, shape, jnp.float32, -1.0, 1.0) / jnp.sqrt(fan_in)

    gc_w = u(ks[0], (P, GHID), P)          # gating conv weight  [C*9, GHID]
    gc_b = u(ks[1], (1, GHID), P)
    gf_w = u(ks[2], (GHID, NCLS), GHID)    # gating fc -> 10
    gf_b = u(ks[3], (1, NCLS), GHID)
    pj_w = u(ks[4], (NCLS, E), NCLS)       # proj_to_experts: Linear(10, E)
    pj_b = u(ks[5], (1, E), NCLS)
    ec_w = u(ks[6], (E, P, EHID), P)       # per-expert conv weights
    ec_b = u(ks[7], (E, 1, EHID), P)
    ef_w = u(ks[8], (E, EHID, NCLS), EHID) # per-expert fc -> 10
    ef_b = u(ks[9], (E, 1, NCLS), EHID)
    return (gc_w, gc_b, gf_w, gf_b, pj_w, pj_b, ec_w, ec_b, ef_w, ef_b)


# ------------------------------ pure-JAX reference check ------------------------------
def reference(x, params):
    gc_w, gc_b, gf_w, gf_b, pj_w, pj_b, ec_w, ec_b, ef_w, ef_b = params

    def small_cnn(x, wc, bc, wf, bf):
        hid, cin = wc.shape[1], x.shape[1]
        w4 = wc.T.reshape(hid, cin, 3, 3)
        y = jax.lax.conv_general_dilated(
            x, w4, window_strides=(1, 1), padding="SAME",
            dimension_numbers=("NCHW", "OIHW", "NCHW"))
        y = jnp.maximum(y + bc.reshape(1, -1, 1, 1), 0.0)
        p = y.mean(axis=(2, 3))
        return p @ wf + bf

    logits10 = small_cnn(x, gc_w, gc_b[0], gf_w, gf_b[0])
    gate = jax.nn.softmax(logits10 @ pj_w + pj_b[0], axis=1)              # [B, E]
    expert_outs = jnp.stack(
        [small_cnn(x, ec_w[e], ec_b[e, 0], ef_w[e], ef_b[e, 0]) for e in range(ec_w.shape[0])],
        axis=1)                                                            # [B, E, NCLS]
    return jnp.sum(gate[..., None] * expert_outs, axis=1)                  # [B, NCLS]


if __name__ == "__main__":
    B, C, H, W = 2, 4, 16, 16
    E, GHID, EHID, NCLS = 4, 32, 32, 10

    key = jax.random.PRNGKey(0)
    kx, kp = jax.random.split(key)
    x = jax.random.normal(kx, (B, C, H, W), jnp.float32)
    params = init_params(kp, C, E, GHID, EHID, NCLS)

    out = jax.block_until_ready(moe_cnn_forward(x, params))
    ref = reference(x, params)
    assert out.shape == (B, NCLS), out.shape
    # bf16 patches / conv weights (with f32 accumulation) vs. an all-f32 reference.
    if not jnp.allclose(out, ref, atol=2e-2, rtol=2e-2):
        raise AssertionError("Pallas kernel mismatch vs JAX reference")
    print("KERNEL_OK")
</pallas_src>

<mosaic_0001>
module attributes {stable_mosaic.version = 11 : i64} {
  func.func @_moe_kernel(%arg0: i32, %arg1: memref<256x36xbf16, #tpu.memory_space<vmem>>, %arg2: memref<36x256xbf16, #tpu.memory_space<vmem>>, %arg3: memref<1x256xf32, #tpu.memory_space<vmem>>, %arg4: memref<32x4xf32, #tpu.memory_space<vmem>>, %arg5: memref<1x4xf32, #tpu.memory_space<vmem>>, %arg6: memref<4x32x10xf32, #tpu.memory_space<vmem>>, %arg7: memref<4x1x10xf32, #tpu.memory_space<vmem>>, %arg8: memref<2x10xf32, #tpu.memory_space<vmem>>, %arg9: memref<2x256xf32, #tpu.memory_space<vmem>>) attributes {dimension_semantics = [#tpu.dimension_semantics<arbitrary>], iteration_bounds = array<i64: 2>, scalar_prefetch = 0 : i64, scratch_operands = 1 : i64, tpu.core_type = #tpu.core_type<tc>, window_params = [{transform_indices = @transform_0, window_bounds = array<i64: 256, 36>}, {pipeline_mode = #tpu.pipeline_mode<synchronous>, transform_indices = @transform_1, window_bounds = array<i64: 36, 256>}, {pipeline_mode = #tpu.pipeline_mode<synchronous>, transform_indices = @transform_2, window_bounds = array<i64: 1, 256>}, {pipeline_mode = #tpu.pipeline_mode<synchronous>, transform_indices = @transform_3, window_bounds = array<i64: 32, 4>}, {pipeline_mode = #tpu.pipeline_mode<synchronous>, transform_indices = @transform_4, window_bounds = array<i64: 1, 4>}, {pipeline_mode = #tpu.pipeline_mode<synchronous>, transform_indices = @transform_5, window_bounds = array<i64: 4, 32, 10>}, {pipeline_mode = #tpu.pipeline_mode<synchronous>, transform_indices = @transform_6, window_bounds = array<i64: 4, 1, 10>}, {pipeline_mode = #tpu.pipeline_mode<synchronous>, transform_indices = @transform_7, window_bounds = array<i64: 2, 10>}]} {
    %c0 = arith.constant 0 : index
    %c0_0 = arith.constant 0 : index
    %0 = vector.load %arg1[%c0, %c0_0] : memref<256x36xbf16, #tpu.memory_space<vmem>>, vector<256x36xbf16>
    %c0_1 = arith.constant 0 : index
    %c0_2 = arith.constant 0 : index
    %1 = vector.load %arg2[%c0_1, %c0_2] : memref<36x256xbf16, #tpu.memory_space<vmem>>, vector<36x256xbf16>
    %cst = arith.constant dense<0.000000e+00> : vector<256x256xf32>
    %2 = tpu.matmul %0, %1, %cst {dimension_numbers = #tpu.dot_dimension_numbers<[1], [0], [0], [1], [0, 0, 1, 1], [], []>} : vector<256x36xbf16>, vector<36x256xbf16>, vector<256x256xf32> -> vector<256x256xf32>
    %c0_3 = arith.constant 0 : index
    %c0_4 = arith.constant 0 : index
    %3 = vector.load %arg3[%c0_3, %c0_4] : memref<1x256xf32, #tpu.memory_space<vmem>>, vector<1x256xf32>
    %4 = vector.broadcast %3 : vector<1x256xf32> to vector<256x256xf32>
    %5 = arith.addf %2, %4 : vector<256x256xf32>
    %cst_5 = arith.constant 0.000000e+00 : f32
    %6 = vector.broadcast %cst_5 : f32 to vector<256x256xf32>
    %7 = arith.maximumf %5, %6 : vector<256x256xf32>
    %cst_6 = arith.constant dense<0.000000e+00> : vector<256xf32>
    %8 = vector.multi_reduction <add>, %7, %cst_6 [0] : vector<256x256xf32> to vector<256xf32>
    %9 = vector.shape_cast %8 : vector<256xf32> to vector<1x256xf32>
    %cst_7 = arith.constant 3.906250e-03 : f32
    %10 = vector.broadcast %cst_7 : f32 to vector<1x256xf32>
    %11 = arith.mulf %9, %10 : vector<1x256xf32>
    %12 = arith.index_cast %arg0 : i32 to index
    %c0_8 = arith.constant 0 : index
    %13 = vector.load %arg9[%12, %c0_8] : memref<2x256xf32, #tpu.memory_space<vmem>>, vector<1x256xf32>
    tpu.vector_store %arg9[%12, %c0_8], %11 {strides = array<i32>} : memref<2x256xf32, #tpu.memory_space<vmem>>, vector<1x256xf32>,
    %c1_i32 = arith.constant 1 : i32
    %14 = arith.cmpi eq, %arg0, %c1_i32 : i32
    %15 = arith.extui %14 : i1 to i32
    %c0_i32 = arith.constant 0 : i32
    %16 = arith.cmpi ne, %15, %c0_i32 : i32
    scf.if %16 {
      %c0_9 = arith.constant 0 : index
      %c0_10 = arith.constant 0 : index
      %17 = vector.load %arg9[%c0_9, %c0_10] : memref<2x256xf32, #tpu.memory_space<vmem>>, vector<2x256xf32>
      %18 = vector.extract_strided_slice %17 {offsets = [0, 0], sizes = [2, 32], strides = [1, 1]} : vector<2x256xf32> to vector<2x32xf32>
      %c0_11 = arith.constant 0 : index
      %c0_12 = arith.constant 0 : index
      %19 = vector.load %arg4[%c0_11, %c0_12] : memref<32x4xf32, #tpu.memory_space<vmem>>, vector<32x4xf32>
      %cst_13 = arith.constant dense<0.000000e+00> : vector<2x4xf32>
      %20 = tpu.matmul %18, %19, %cst_13 {dimension_numbers = #tpu.dot_dimension_numbers<[1], [0], [0], [1], [0, 0, 1, 1], [], []>} : vector<2x32xf32>, vector<32x4xf32>, vector<2x4xf32> -> vector<2x4xf32>
      %c0_14 = arith.constant 0 : index
      %c0_15 = arith.constant 0 : index
      %21 = vector.load %arg5[%c0_14, %c0_15] : memref<1x4xf32, #tpu.memory_space<vmem>>, vector<1x4xf32>
      %22 = vector.broadcast %21 : vector<1x4xf32> to vector<2x4xf32>
      %23 = arith.addf %20, %22 : vector<2x4xf32>
      %cst_16 = arith.constant dense<0xFF800000> : vector<2xf32>
      %24 = vector.multi_reduction <maximumf>, %23, %cst_16 [1] : vector<2x4xf32> to vector<2xf32>
      %25 = vector.shape_cast %24 : vector<2xf32> to vector<2x1xf32>
      %26 = vector.broadcast %25 : vector<2x1xf32> to vector<2x4xf32>
      %27 = arith.subf %23, %26 : vector<2x4xf32>
      %28 = math.exp %27 : vector<2x4xf32>
      %cst_17 = arith.constant dense<0.000000e+00> : vector<2xf32>
      %29 = vector.multi_reduction <add>, %28, %cst_17 [1] : vector<2x4xf32> to vector<2xf32>
      %30 = vector.shape_cast %29 : vector<2xf32> to vector<2x1xf32>
      %31 = vector.broadcast %30 : vector<2x1xf32> to vector<2x4xf32>
      %32 = arith.divf %28, %31 : vector<2x4xf32>
      %cst_18 = arith.constant 0.000000e+00 : f32
      %33 = vector.broadcast %cst_18 : f32 to vector<2x10xf32>
      %34 = vector.extract_strided_slice %17 {offsets = [0, 32], sizes = [2, 32], strides = [1, 1]} : vector<2x256xf32> to vector<2x32xf32>
      %c0_19 = arith.constant 0 : index
      %c0_20 = arith.constant 0 : index
      %c0_21 = arith.constant 0 : index
      %35 = vector.load %arg6[%c0_19, %c0_20, %c0_21] : memref<4x32x10xf32, #tpu.memory_space<vmem>>, vector<1x32x10xf32>
      %36 = vector.shape_cast %35 : vector<1x32x10xf32> to vector<32x10xf32>
      %cst_22 = arith.constant dense<0.000000e+00> : vector<2x10xf32>
      %37 = tpu.matmul %34, %36, %cst_22 {dimension_numbers = #tpu.dot_dimension_numbers<[1], [0], [0], [1], [0, 0, 1, 1], [], []>} : vector<2x32xf32>, vector<32x10xf32>, vector<2x10xf32> -> vector<2x10xf32>
      %c0_23 = arith.constant 0 : index
      %c0_24 = arith.constant 0 : index
      %c0_25 = arith.constant 0 : index
      %38 = vector.load %arg7[%c0_23, %c0_24, %c0_25] : memref<4x1x10xf32, #tpu.memory_space<vmem>>, vector<1x1x10xf32>
      %39 = vector.shape_cast %38 : vector<1x1x10xf32> to vector<1x10xf32>
      %40 = vector.broadcast %39 : vector<1x10xf32> to vector<2x10xf32>
      %41 = arith.addf %37, %40 : vector<2x10xf32>
      %42 = vector.extract_strided_slice %32 {offsets = [0, 0], sizes = [2, 1], strides = [1, 1]} : vector<2x4xf32> to vector<2x1xf32>
      %43 = vector.broadcast %42 : vector<2x1xf32> to vector<2x10xf32>
      %44 = arith.mulf %43, %41 : vector<2x10xf32>
      %45 = arith.addf %33, %44 : vector<2x10xf32>
      %46 = vector.extract_strided_slice %17 {offsets = [0, 64], sizes = [2, 32], strides = [1, 1]} : vector<2x256xf32> to vector<2x32xf32>
      %c1 = arith.constant 1 : index
      %c0_26 = arith.constant 0 : index
      %c0_27 = arith.constant 0 : index
      %47 = vector.load %arg6[%c1, %c0_26, %c0_27] : memref<4x32x10xf32, #tpu.memory_space<vmem>>, vector<1x32x10xf32>
      %48 = vector.shape_cast %47 : vector<1x32x10xf32> to vector<32x10xf32>
      %cst_28 = arith.constant dense<0.000000e+00> : vector<2x10xf32>
      %49 = tpu.matmul %46, %48, %cst_28 {dimension_numbers = #tpu.dot_dimension_numbers<[1], [0], [0], [1], [0, 0, 1, 1], [], []>} : vector<2x32xf32>, vector<32x10xf32>, vector<2x10xf32> -> vector<2x10xf32>
      %c1_29 = arith.constant 1 : index
      %c0_30 = arith.constant 0 : index
      %c0_31 = arith.constant 0 : index
      %50 = vector.load %arg7[%c1_29, %c0_30, %c0_31] : memref<4x1x10xf32, #tpu.memory_space<vmem>>, vector<1x1x10xf32>
      %51 = vector.shape_cast %50 : vector<1x1x10xf32> to vector<1x10xf32>
      %52 = vector.broadcast %51 : vector<1x10xf32> to vector<2x10xf32>
      %53 = arith.addf %49, %52 : vector<2x10xf32>
      %54 = vector.extract_strided_slice %32 {offsets = [0, 1], sizes = [2, 1], strides = [1, 1]} : vector<2x4xf32> to vector<2x1xf32>
      %55 = vector.broadcast %54 : vector<2x1xf32> to vector<2x10xf32>
      %56 = arith.mulf %55, %53 : vector<2x10xf32>
      %57 = arith.addf %45, %56 : vector<2x10xf32>
      %58 = vector.extract_strided_slice %17 {offsets = [0, 96], sizes = [2, 32], strides = [1, 1]} : vector<2x256xf32> to vector<2x32xf32>
      %c2 = arith.constant 2 : index
      %c0_32 = arith.constant 0 : index
      %c0_33 = arith.constant 0 : index
      %59 = vector.load %arg6[%c2, %c0_32, %c0_33] : memref<4x32x10xf32, #tpu.memory_space<vmem>>, vector<1x32x10xf32>
      %60 = vector.shape_cast %59 : vector<1x32x10xf32> to vector<32x10xf32>
      %cst_34 = arith.constant dense<0.000000e+00> : vector<2x10xf32>
      %61 = tpu.matmul %58, %60, %cst_34 {dimension_numbers = #tpu.dot_dimension_numbers<[1], [0], [0], [1], [0, 0, 1, 1], [], []>} : vector<2x32xf32>, vector<32x10xf32>, vector<2x10xf32> -> vector<2x10xf32>
      %c2_35 = arith.constant 2 : index
      %c0_36 = arith.constant 0 : index
      %c0_37 = arith.constant 0 : index
      %62 = vector.load %arg7[%c2_35, %c0_36, %c0_37] : memref<4x1x10xf32, #tpu.memory_space<vmem>>, vector<1x1x10xf32>
      %63 = vector.shape_cast %62 : vector<1x1x10xf32> to vector<1x10xf32>
      %64 = vector.broadcast %63 : vector<1x10xf32> to vector<2x10xf32>
      %65 = arith.addf %61, %64 : vector<2x10xf32>
      %66 = vector.extract_strided_slice %32 {offsets = [0, 2], sizes = [2, 1], strides = [1, 1]} : vector<2x4xf32> to vector<2x1xf32>
      %67 = vector.broadcast %66 : vector<2x1xf32> to vector<2x10xf32>
      %68 = arith.mulf %67, %65 : vector<2x10xf32>
      %69 = arith.addf %57, %68 : vector<2x10xf32>
      %70 = vector.extract_strided_slice %17 {offsets = [0, 128], sizes = [2, 32], strides = [1, 1]} : vector<2x256xf32> to vector<2x32xf32>
      %c3 = arith.constant 3 : index
      %c0_38 = arith.constant 0 : index
      %c0_39 = arith.constant 0 : index
      %71 = vector.load %arg6[%c3, %c0_38, %c0_39] : memref<4x32x10xf32, #tpu.memory_space<vmem>>, vector<1x32x10xf32>
      %72 = vector.shape_cast %71 : vector<1x32x10xf32> to vector<32x10xf32>
      %cst_40 = arith.constant dense<0.000000e+00> : vector<2x10xf32>
      %73 = tpu.matmul %70, %72, %cst_40 {dimension_numbers = #tpu.dot_dimension_numbers<[1], [0], [0], [1], [0, 0, 1, 1], [], []>} : vector<2x32xf32>, vector<32x10xf32>, vector<2x10xf32> -> vector<2x10xf32>
      %c3_41 = arith.constant 3 : index
      %c0_42 = arith.constant 0 : index
      %c0_43 = arith.constant 0 : index
      %74 = vector.load %arg7[%c3_41, %c0_42, %c0_43] : memref<4x1x10xf32, #tpu.memory_space<vmem>>, vector<1x1x10xf32>
      %75 = vector.shape_cast %74 : vector<1x1x10xf32> to vector<1x10xf32>
      %76 = vector.broadcast %75 : vector<1x10xf32> to vector<2x10xf32>
      %77 = arith.addf %73, %76 : vector<2x10xf32>
      %78 = vector.extract_strided_slice %32 {offsets = [0, 3], sizes = [2, 1], strides = [1, 1]} : vector<2x4xf32> to vector<2x1xf32>
      %79 = vector.broadcast %78 : vector<2x1xf32> to vector<2x10xf32>
      %80 = arith.mulf %79, %77 : vector<2x10xf32>
      %81 = arith.addf %69, %80 : vector<2x10xf32>
      %c0_44 = arith.constant 0 : index
      %c0_45 = arith.constant 0 : index
      %82 = vector.load %arg8[%c0_44, %c0_45] : memref<2x10xf32, #tpu.memory_space<vmem>>, vector<2x10xf32>
      tpu.vector_store %arg8[%c0_44, %c0_45], %81 {strides = array<i32>} : memref<2x10xf32, #tpu.memory_space<vmem>>, vector<2x10xf32>,
    } else {
    }
    return
  }
  func.func @transform_0(%arg0: i32) -> (i32, i32) {
    %c0_i32 = arith.constant 0 : i32
    %c0_i32_0 = arith.constant 0 : i32
    return %arg0, %c0_i32 : i32, i32
  }
  func.func @transform_1(%arg0: i32) -> (i32, i32) {
    %c0_i32 = arith.constant 0 : i32
    %c0_i32_0 = arith.constant 0 : i32
    %c0_i32_1 = arith.constant 0 : i32
    return %c0_i32, %c0_i32_0 : i32, i32
  }
  func.func @transform_2(%arg0: i32) -> (i32, i32) {
    %c0_i32 = arith.constant 0 : i32
    %c0_i32_0 = arith.constant 0 : i32
    %c0_i32_1 = arith.constant 0 : i32
    return %c0_i32, %c0_i32_0 : i32, i32
  }
  func.func @transform_3(%arg0: i32) -> (i32, i32) {
    %c0_i32 = arith.constant 0 : i32
    %c0_i32_0 = arith.constant 0 : i32
    %c0_i32_1 = arith.constant 0 : i32
    return %c0_i32, %c0_i32_0 : i32, i32
  }
  func.func @transform_4(%arg0: i32) -> (i32, i32) {
    %c0_i32 = arith.constant 0 : i32
    %c0_i32_0 = arith.constant 0 : i32
    %c0_i32_1 = arith.constant 0 : i32
    return %c0_i32, %c0_i32_0 : i32, i32
  }
  func.func @transform_5(%arg0: i32) -> (i32, i32, i32) {
    %c0_i32 = arith.constant 0 : i32
    %c0_i32_0 = arith.constant 0 : i32
    %c0_i32_1 = arith.constant 0 : i32
    %c0_i32_2 = arith.constant 0 : i32
    return %c0_i32, %c0_i32_0, %c0_i32_1 : i32, i32, i32
  }
  func.func @transform_6(%arg0: i32) -> (i32, i32, i32) {
    %c0_i32 = arith.constant 0 : i32
    %c0_i32_0 = arith.constant 0 : i32
    %c0_i32_1 = arith.constant 0 : i32
    %c0_i32_2 = arith.constant 0 : i32
    return %c0_i32, %c0_i32_0, %c0_i32_1 : i32, i32, i32
  }
  func.func @transform_7(%arg0: i32) -> (i32, i32) {
    %c0_i32 = arith.constant 0 : i32
    %c0_i32_0 = arith.constant 0 : i32
    %c0_i32_1 = arith.constant 0 : i32
    return %c0_i32, %c0_i32_0 : i32, i32
  }
}

</mosaic_0001>

<bundles_post_ra>
// kernel: tpu_custom_call.1
= control target key start
LH: loop header
LB: loop body
LE: loop exit
PB: predicated region body
PF: predicated region fallthrough
CT: control target
= control target key end

     0   :  { %12 = vsyncpa [#allocation4], 0  ;;  %s1719_s24 = smov 0   ;;  %s2111_s0 = inlined_call_operand.vmem [shape: bf16[512,36], index: 0, kind: input, shape index: {}]   ;;  %s2112_s1 = inlined_call_operand.vmem [shape: bf16[36,256], index: 1, kind: input, shape index: {}]   ;;  %s2113_s2 = inlined_call_operand.vmem [shape: f32[1,256], index: 2, kind: input, shape index: {}]   ;;  %s2114_s3 = inlined_call_operand.vmem [shape: f32[32,4], index: 3, kind: input, shape index: {}]   ;;  %s2115_s4 = inlined_call_operand.vmem [shape: f32[1,4], index: 4, kind: input, shape index: {}]   ;;  %s2116_s5 = inlined_call_operand.vmem [shape: f32[4,32,10], index: 5, kind: input, shape index: {}]   ;;  %s2117_s6 = inlined_call_operand.vmem [shape: f32[4,1,10], index: 6, kind: input, shape index: {}]   ;;  %s2118_s7 = inlined_call_operand.hbm [shape: f32[2,10], index: 7, kind: output, shape index: {}]  }
   0x1 LB: > { %s1725_s25 = sadd.s32 4294967295, %s1663_s24   ;;  %p1375_p0 = scmp.ge.s32.totalorder %s1663_s24, 1  ;;  %s1663_s24 = sphi %s1719_s24, %s18_s24  }
   0x2   : > { %p234_p1 = scmp.lt.s32.totalorder %s1663_s24, 3 }
   0x4   : > { %p235_p2 = pnand %p1375_p0, %p234_p1 }
   0x5   : > { %v1594_v0 = vld [vmem:[%s2112_s1 + $0x4] ss:$8 sps:$4 sm:$0xff] (!%p235_p2)   ;;  %v1596_v1 = vld [vmem:[%s2112_s1] ss:$8 sps:$4 sm:$0xff] (!%p235_p2)   ;;  %v1665_v2 = vmov (!%p235_p2), 0   ;;  %s1376_s30 = sshll.u32 (!%p235_p2), %s1725_s25, 5  ;;  %v307_v25 = vlaneseq (!%p235_p2) }
   0x6   : > { %238 = sbr.rel (%p235_p2) target bundleno = 1052 (0x41c), region = 48  ;;  %510 = vmatprep.mubr.bf16.mxu0 (!%p235_p2), %v1665_v2  ;;  %590 = vmatprep.mubr.bf16.mxu1 (!%p235_p2), %v1665_v2  ;;  %v1597_v3 = vld [vmem:[%s2112_s1 + $0x14] ss:$8 sps:$4 sm:$0xff] (!%p235_p2)   ;;  %v304_v4 = vld [vmem:[%s2112_s1 + $0x20] sm:$0x33] (!%p235_p2)  ;;  %p262_p3 = scmp.lt.s32.totalorder (!%p235_p2), %s1376_s30, 63 }
   0x7   : > { %478 = vmatprep.subr.bf16.mxu0 (!%p235_p2), %v1594_v0  ;;  %1560 = vmatprep.subr.bf16.mxu1 (!%p235_p2), %v1594_v0  ;;  %v1599_v5 = vld [vmem:[%s2112_s1 + $0x10] ss:$8 sps:$4 sm:$0xff] (!%p235_p2)   ;;  %v1399_v6 = vcombine.high (!%p235_p2), %v304_v4, %v304_v4  ;;  %v1398_v7 = vcombine.low (!%p235_p2), %v304_v4, %v304_v4  ;;  %vm471_vm0 = vcmask (!%p235_p2), 1041408   ;;  %vm422_vm1 = vcmask (!%p235_p2), 293888   ;;  %v305_v28 = vld [vmem:[%s2113_s2] sm:$0x3] (!%p235_p2) }
   0x8   : > { %479 = vmatpush1.bf16.msra.mxu0 (!%p235_p2), %v1596_v1  ;;  %1563 = vmatpush1.bf16.msra.mxu1 (!%p235_p2), %v1596_v1  ;;  %v1799_v26 = vshrl.u32 (!%p235_p2), %v307_v25, 7  ;;  %s833_s20 = sshra.s32 (!%p235_p2), %s1725_s25, 1  ;;  %s836_s21 = sand.u32 (!%p235_p2), 1, %s1725_s25  ;;  %vm831_vm2 = vcmp.lt.s32.totalorder (!%p235_p2), %v307_v25, 256 }
   0x9   : > { %480 = vmatprep.subr.bf16.mxu0 (!%p235_p2), %v1597_v3  ;;  %1561 = vmatprep.subr.bf16.mxu1 (!%p235_p2), %v1597_v3  ;;  %v473_v8 = vsel (!%p235_p2), %vm471_vm0, %v1398_v7, 0  ;;  %s1449_s22 = sshll.u32 (!%p235_p2), %s833_s20, 2  ;;  %p1419_p4 = scmp.ne.s32.totalorder (!%p235_p2), %s1725_s25, 1 }
   0xa   : > { %v309_v27 = vsub.s32 (!%p235_p2), 0, %v1799_v26  ;;  %v313_v29 = vsub.s32 (!%p235_p2), 1, %v1799_v26  ;;  %s839_s23 = sadd.s32 (!%p235_p2), %s1449_s22, %s836_s21 }
   0xb   : > { %s840_s26 = scalar_lea.vmem (!%p235_p2), [#allocation2], %s839_s23 }
   0xc   : > { %481 = vmatpush1.bf16.msra.mxu0 (!%p235_p2), %v1599_v5  ;;  %1564 = vmatpush1.bf16.msra.mxu1 (!%p235_p2), %v1599_v5  ;;  %v1806_v30 = vrot.slane (!%p235_p2), %v305_v28, %v309_v27  ;;  %v1808_v31 = vrot.slane (!%p235_p2), %v305_v28, %v313_v29 }
   0xd   : > { %s2120_s30 = smov (!%p262_p3, %s1376_s30), 63  ;;  %1400 = vmatprep.subr.msk.bf16.mxu0 %vm471_vm0, %v1399_v6  ;;  %1562 = vmatprep.subr.msk.bf16.mxu1 %vm471_vm0, %v1399_v6  ;;  %vm1668_vm3 = vmmov (!%p1419_p4), 0   ;;  %vm858_vm4 = vcmask (!%p1419_p4), 261120   ;;  %s1671_s12 = smov (!%p1419_p4), 96   ;;  %vm932_vm5 = vcmask (!%p1419_p4), 25600   ;;  %vm1321_vm6 = vcmask (!%p1419_p4), 74752  }
   0xe   : > { %s1377_s14 = sshll.u32 %s2120_s30, 2  ;;  %s1672_s13 = smov (!%p1419_p4), 32  }
   0xf   : > { %s1750_s17 = scalar_lea.vmem %s2111_s0, %s1377_s14  ;;  %s1673_s22 = smov (!%p1419_p4), 64  }
  0x10   : > { %v1602_v9 = vld [vmem:[%s1750_s17] sm:$0xff]   ;;  %483 = vmatpush1.bf16.msra.mxu0 %v473_v8  ;;  %1565 = vmatpush1.bf16.msra.mxu1 %v473_v8  ;;  %v1603_v11 = vld [vmem:[%s1750_s17 + $0x8] sm:$0xff]   ;;  %v1604_v13 = vld [vmem:[%s1750_s17 + $0x10] sm:$0xff]  }
  0x11   : > { %v1606_v10 = vld [vmem:[%s1750_s17 + $0x40] sm:$0xff]   ;;  %v1608_v12 = vld [vmem:[%s1750_s17 + $0x48] sm:$0xff]   ;;  %v1610_v14 = vld [vmem:[%s1750_s17 + $0x50] sm:$0xff]  }
  0x12   : > { %v1605_v15 = vld [vmem:[%s1750_s17 + $0x18] sm:$0xff]   ;;  %v1607_v17 = vld [vmem:[%s1750_s17 + $0x20] sm:$0xff]   ;;  %v1609_v19 = vld [vmem:[%s1750_s17 + $0x28] sm:$0xff]  }
  0x13   : > { %1401 = vmatmul.mubr.msk.bf16.vlgmr.msra.gmra.mrb[0].mxu0 %vm422_vm1, %v1602_v9  ;;  %1409 = vmatmul.mubr.msk.bf16.vlgmr.msra.gmra.mrb[0].mxu1 %vm422_vm1, %v1606_v10  ;;  %v1612_v16 = vld [vmem:[%s1750_s17 + $0x58] sm:$0xff]   ;;  %v1614_v18 = vld [vmem:[%s1750_s17 + $0x60] sm:$0xff]   ;;  %v1615_v20 = vld [vmem:[%s1750_s17 + $0x68] sm:$0xff]  }
  0x14   : > { %520 = vmatprep.mubr.bf16.mxu0 %v1665_v2  ;;  %600 = vmatprep.mubr.bf16.mxu1 %v1665_v2  ;;  %v1611_v21 = vld [vmem:[%s1750_s17 + $0x30] sm:$0xff]   ;;  %v1613_v23 = vld [vmem:[%s1750_s17 + $0x38] sm:$0xff]  }
  0x15   : > { %v1616_v22 = vld [vmem:[%s1750_s17 + $0x70] sm:$0xff]   ;;  %v1617_v24 = vld [vmem:[%s1750_s17 + $0x78] sm:$0xff]  }
  0x1b   : > { %1402 = vmatmul.mubr.msk.bf16.gmra.mrb[4].mxu0 %vm422_vm1, %v1603_v11  ;;  %1410 = vmatmul.mubr.msk.bf16.gmra.mrb[4].mxu1 %vm422_vm1, %v1608_v12 }
  0x1c   : > { %530 = vmatprep.mubr.bf16.mxu0 %v1665_v2  ;;  %610 = vmatprep.mubr.bf16.mxu1 %v1665_v2 }
  0x23   : > { %1403 = vmatmul.mubr.msk.bf16.gmra.mrb[8].mxu0 %vm422_vm1, %v1604_v13  ;;  %1411 = vmatmul.mubr.msk.bf16.gmra.mrb[8].mxu1 %vm422_vm1, %v1610_v14 }
  0x24   : > { %540 = vmatprep.mubr.bf16.mxu0 %v1665_v2  ;;  %620 = vmatprep.mubr.bf16.mxu1 %v1665_v2 }
  0x2b   : > { %1404 = vmatmul.mubr.msk.bf16.gmra.mrb[12].mxu0 %vm422_vm1, %v1605_v15  ;;  %1412 = vmatmul.mubr.msk.bf16.gmra.mrb[12].mxu1 %vm422_vm1, %v1612_v16 }
  0x2c   : > { %550 = vmatprep.mubr.bf16.mxu0 %v1665_v2  ;;  %630 = vmatprep.mubr.bf16.mxu1 %v1665_v2 }
  0x33   : > { %1405 = vmatmul.mubr.msk.bf16.gmra.mrb[16].mxu0 %vm422_vm1, %v1607_v17  ;;  %1413 = vmatmul.mubr.msk.bf16.gmra.mrb[16].mxu1 %vm422_vm1, %v1614_v18 }
  0x34   : > { %560 = vmatprep.mubr.bf16.mxu0 %v1665_v2  ;;  %640 = vmatprep.mubr.bf16.mxu1 %v1665_v2 }
  0x3b   : > { %1406 = vmatmul.mubr.msk.bf16.gmra.mrb[20].mxu0 %vm422_vm1, %v1609_v19  ;;  %1414 = vmatmul.mubr.msk.bf16.gmra.mrb[20].mxu1 %vm422_vm1, %v1615_v20 }
  0x3c   : > { %570 = vmatprep.mubr.bf16.mxu0 %v1665_v2  ;;  %650 = vmatprep.mubr.bf16.mxu1 %v1665_v2 }
  0x43   : > { %1407 = vmatmul.mubr.msk.bf16.gmra.mrb[24].mxu0 %vm422_vm1, %v1611_v21  ;;  %1415 = vmatmul.mubr.msk.bf16.gmra.mrb[24].mxu1 %vm422_vm1, %v1616_v22 }
  0x44   : > { %580 = vmatprep.mubr.bf16.mxu0 %v1665_v2  ;;  %660 = vmatprep.mubr.bf16.mxu1 %v1665_v2 }
  0x4b   : > { %1408 = vmatmul.mubr.msk.bf16.gmra.mrb[28].mxu0 %vm422_vm1, %v1613_v23  ;;  %1416 = vmatmul.mubr.msk.bf16.gmra.mrb[28].mxu1 %vm422_vm1, %v1617_v24 }
  0xe6   : > { %v512_v32 = vpop.f32.mrb[0].mxu0  ;;  %v1811_v35 = vpop.f32.mrb[0].mxu1 }
  0xe7   : > { %v513_v33 = vadd.f32 %v512_v32, %v1806_v30  ;;  %v514_v34 = vpop.f32.mrb[1].mxu0  ;;  %v1814_v38 = vpop.f32.mrb[1].mxu1 }
  0xe8   : > { %v515_v36 = vadd.f32 %v514_v34, %v1808_v31  ;;  %v516_v37 = vpop.f32.mrb[2].mxu0  ;;  %v1817_v41 = vpop.f32.mrb[2].mxu1 }
  0xe9   : > { %v517_v39 = vadd.f32 %v516_v37, %v1806_v30  ;;  %v518_v40 = vpop.f32.mrb[3].mxu0  ;;  %v1820_v43 = vpop.f32.mrb[3].mxu1  ;;  %v671_v44 = vmax.f32 %v513_v33, 0.0 }
  0xea   : > { %v519_v42 = vadd.f32 %v518_v40, %v1808_v31  ;;  %v672_v46 = vmax.f32 %v515_v36, 0.0 }
  0xeb   : > { %v673_v45 = vmax.f32 %v517_v39, 0.0 }
  0xec   : > { %v674_v47 = vmax.f32 %v519_v42, 0.0 }
  0xed   : > { %v735_v48 = vadd.f32 %v673_v45, %v671_v44 }
  0xee   : > { %v772_v49 = vadd.f32 %v674_v47, %v672_v46  ;;  %v522_v50 = vpop.f32.mrb[4].mxu0  ;;  %v1823_v53 = vpop.f32.mrb[4].mxu1 }
  0xef   : > { %v523_v51 = vadd.f32 %v522_v50, %v1806_v30  ;;  %v524_v52 = vpop.f32.mrb[5].mxu0  ;;  %v1826_v56 = vpop.f32.mrb[5].mxu1 }
  0xf0   : > { %v525_v54 = vadd.f32 %v524_v52, %v1808_v31  ;;  %v526_v55 = vpop.f32.mrb[6].mxu0  ;;  %v1829_v60 = vpop.f32.mrb[6].mxu1 }
  0xf1   : > { %v675_v57 = vmax.f32 %v523_v51, 0.0  ;;  %v527_v58 = vadd.f32 %v526_v55, %v1806_v30  ;;  %v528_v59 = vpop.f32.mrb[7].mxu0  ;;  %v1832_v63 = vpop.f32.mrb[7].mxu1 }
  0xf2   : > { %v676_v61 = vmax.f32 %v525_v54, 0.0  ;;  %v529_v62 = vadd.f32 %v528_v59, %v1808_v31 }
  0xf3   : > { %v736_v0 = vadd.f32 %v735_v48, %v675_v57  ;;  %v677_v1 = vmax.f32 %v527_v58, 0.0 }
  0xf4   : > { %v773_v2 = vadd.f32 %v772_v49, %v676_v61  ;;  %v678_v3 = vmax.f32 %v529_v62, 0.0 }
  0xf5   : > { %v737_v4 = vadd.f32 %v736_v0, %v677_v1 }
  0xf6   : > { %v774_v5 = vadd.f32 %v773_v2, %v678_v3  ;;  %v532_v6 = vpop.f32.mrb[8].mxu0  ;;  %v1835_v9 = vpop.f32.mrb[8].mxu1 }
  0xf7   : > { %v533_v7 = vadd.f32 %v532_v6, %v1806_v30  ;;  %v534_v8 = vpop.f32.mrb[9].mxu0  ;;  %v1838_v12 = vpop.f32.mrb[9].mxu1 }
  0xf8   : > { %v535_v10 = vadd.f32 %v534_v8, %v1808_v31  ;;  %v536_v11 = vpop.f32.mrb[10].mxu0  ;;  %v1841_v16 = vpop.f32.mrb[10].mxu1 }
  0xf9   : > { %v679_v13 = vmax.f32 %v533_v7, 0.0  ;;  %v537_v14 = vadd.f32 %v536_v11, %v1806_v30  ;;  %v538_v15 = vpop.f32.mrb[11].mxu0  ;;  %v1844_v19 = vpop.f32.mrb[11].mxu1 }
  0xfa   : > { %v680_v17 = vmax.f32 %v535_v10, 0.0  ;;  %v539_v18 = vadd.f32 %v538_v15, %v1808_v31 }
  0xfb   : > { %v738_v20 = vadd.f32 %v737_v4, %v679_v13  ;;  %v681_v21 = vmax.f32 %v537_v14, 0.0 }
  0xfc   : > { %v775_v22 = vadd.f32 %v774_v5, %v680_v17  ;;  %v682_v23 = vmax.f32 %v539_v18, 0.0 }
  0xfd   : > { %v739_v24 = vadd.f32 %v738_v20, %v681_v21 }
  0xfe   : > { %v776_v27 = vadd.f32 %v775_v22, %v682_v23  ;;  %v542_v28 = vpop.f32.mrb[12].mxu0  ;;  %v1847_v33 = vpop.f32.mrb[12].mxu1 }
  0xff   : > { %v543_v29 = vadd.f32 %v542_v28, %v1806_v30  ;;  %v544_v32 = vpop.f32.mrb[13].mxu0  ;;  %v1850_v37 = vpop.f32.mrb[13].mxu1 }
 0x100   : > { %v545_v34 = vadd.f32 %v544_v32, %v1808_v31  ;;  %v546_v36 = vpop.f32.mrb[14].mxu0  ;;  %v1853_v44 = vpop.f32.mrb[14].mxu1 }
 0x101   : > { %v683_v39 = vmax.f32 %v543_v29, 0.0  ;;  %v547_v40 = vadd.f32 %v546_v36, %v1806_v30  ;;  %v548_v42 = vpop.f32.mrb[15].mxu0  ;;  %v1856_v47 = vpop.f32.mrb[15].mxu1 }
 0x102   : > { %v684_v45 = vmax.f32 %v545_v34, 0.0  ;;  %v549_v46 = vadd.f32 %v548_v42, %v1808_v31 }
 0x103   : > { %v740_v48 = vadd.f32 %v739_v24, %v683_v39  ;;  %v685_v49 = vmax.f32 %v547_v40, 0.0 }
 0x104   : > { %v777_v50 = vadd.f32 %v776_v27, %v684_v45  ;;  %v686_v51 = vmax.f32 %v549_v46, 0.0 }
 0x105   : > { %v741_v52 = vadd.f32 %v740_v48, %v685_v49 }
 0x106   : > { %v778_v54 = vadd.f32 %v777_v50, %v686_v51  ;;  %v552_v55 = vpop.f32.mrb[16].mxu0  ;;  %v1859_v59 = vpop.f32.mrb[16].mxu1 }
 0x107   : > { %v553_v57 = vadd.f32 %v552_v55, %v1806_v30  ;;  %v554_v58 = vpop.f32.mrb[17].mxu0  ;;  %v1862_v0 = vpop.f32.mrb[17].mxu1 }
 0x108   : > { %v555_v61 = vadd.f32 %v554_v58, %v1808_v31  ;;  %v556_v62 = vpop.f32.mrb[18].mxu0  ;;  %v1865_v4 = vpop.f32.mrb[18].mxu1 }
 0x109   : > { %v687_v1 = vmax.f32 %v553_v57, 0.0  ;;  %v557_v2 = vadd.f32 %v556_v62, %v1806_v30  ;;  %v558_v3 = vpop.f32.mrb[19].mxu0  ;;  %v1868_v7 = vpop.f32.mrb[19].mxu1 }
 0x10a   : > { %v688_v5 = vmax.f32 %v555_v61, 0.0  ;;  %v559_v6 = vadd.f32 %v558_v3, %v1808_v31 }
 0x10b   : > { %v742_v8 = vadd.f32 %v741_v52, %v687_v1  ;;  %v689_v10 = vmax.f32 %v557_v2, 0.0 }
 0x10c   : > { %v779_v11 = vadd.f32 %v778_v54, %v688_v5  ;;  %v690_v13 = vmax.f32 %v559_v6, 0.0 }
 0x10d   : > { %v743_v14 = vadd.f32 %v742_v8, %v689_v10 }
 0x10e   : > { %v780_v15 = vadd.f32 %v779_v11, %v690_v13  ;;  %v562_v17 = vpop.f32.mrb[20].mxu0  ;;  %v1871_v21 = vpop.f32.mrb[20].mxu1 }
 0x10f   : > { %v563_v18 = vadd.f32 %v562_v17, %v1806_v30  ;;  %v564_v20 = vpop.f32.mrb[21].mxu0  ;;  %v1874_v24 = vpop.f32.mrb[21].mxu1 }
 0x110   : > { %v565_v22 = vadd.f32 %v564_v20, %v1808_v31  ;;  %v566_v23 = vpop.f32.mrb[22].mxu0  ;;  %v1877_v32 = vpop.f32.mrb[22].mxu1 }
 0x111   : > { %v691_v27 = vmax.f32 %v563_v18, 0.0  ;;  %v567_v28 = vadd.f32 %v566_v23, %v1806_v30  ;;  %v568_v29 = vpop.f32.mrb[23].mxu0  ;;  %v1880_v39 = vpop.f32.mrb[23].mxu1 }
 0x112   : > { %v692_v34 = vmax.f32 %v565_v22, 0.0  ;;  %v569_v36 = vadd.f32 %v568_v29, %v1808_v31  ;;  %v593_v29 = vadd.f32 %v1811_v35, %v1806_v30  ;;  %v599_v35 = vadd.f32 %v1820_v43, %v1808_v31 }
 0x113   : > { %v744_v40 = vadd.f32 %v743_v14, %v691_v27  ;;  %v693_v42 = vmax.f32 %v567_v28, 0.0  ;;  %v609_v43 = vadd.f32 %v1832_v63, %v1808_v31  ;;  %v619_v63 = vadd.f32 %v1844_v19, %v1808_v31 }
 0x114   : > { %v781_v45 = vadd.f32 %v780_v15, %v692_v34  ;;  %v694_v46 = vmax.f32 %v569_v36, 0.0  ;;  %v629_v19 = vadd.f32 %v1856_v47, %v1808_v31  ;;  %v639_v47 = vadd.f32 %v1868_v7, %v1808_v31 }
 0x115   : > { %v745_v48 = vadd.f32 %v744_v40, %v693_v42  ;;  %v649_v7 = vadd.f32 %v1880_v39, %v1808_v31 }
 0x116   : > { %v782_v49 = vadd.f32 %v781_v45, %v694_v46  ;;  %v572_v50 = vpop.f32.mrb[24].mxu0  ;;  %v1883_v54 = vpop.f32.mrb[24].mxu1  ;;  %v595_v45 = vadd.f32 %v1814_v38, %v1808_v31 }
 0x117   : > { %v573_v51 = vadd.f32 %v572_v50, %v1806_v30  ;;  %v574_v52 = vpop.f32.mrb[25].mxu0  ;;  %v1886_v58 = vpop.f32.mrb[25].mxu1  ;;  %v597_v50 = vadd.f32 %v1817_v41, %v1806_v30  ;;  %v607_v41 = vadd.f32 %v1829_v60, %v1806_v30  ;;  %v617_v60 = vadd.f32 %v1841_v16, %v1806_v30 }
 0x118   : > { %v575_v55 = vadd.f32 %v574_v52, %v1808_v31  ;;  %v576_v57 = vpop.f32.mrb[26].mxu0  ;;  %v1889_v2 = vpop.f32.mrb[26].mxu1  ;;  %v627_v16 = vadd.f32 %v1853_v44, %v1806_v30  ;;  %v637_v44 = vadd.f32 %v1865_v4, %v1806_v30  ;;  %v647_v4 = vadd.f32 %v1877_v32, %v1806_v30 }
 0x119   : > { %v695_v61 = vmax.f32 %v573_v51, 0.0  ;;  %v577_v62 = vadd.f32 %v576_v57, %v1806_v30  ;;  %v578_v1 = vpop.f32.mrb[27].mxu0  ;;  %v1892_v6 = vpop.f32.mrb[27].mxu1  ;;  %v657_v32 = vadd.f32 %v1889_v2, %v1806_v30  ;;  %v726_v39 = vmax.f32 %v649_v7, 0.0 }
 0x11a   : > { %v696_v3 = vmax.f32 %v575_v55, 0.0  ;;  %v579_v5 = vadd.f32 %v578_v1, %v1808_v31  ;;  %v704_v1 = vmax.f32 %v595_v45, 0.0  ;;  %v1670_v7 = vmov (!%p1419_p4), 1983009808  }
 0x11b   : > { %v746_v8 = vadd.f32 %v745_v48, %v695_v61  ;;  %v697_v10 = vmax.f32 %v577_v62, 0.0  ;;  %v703_v61 = vmax.f32 %v593_v29, 0.0  ;;  %v603_v62 = vadd.f32 %v1823_v53, %v1806_v30 }
 0x11c   : > { %v783_v11 = vadd.f32 %v782_v49, %v696_v3  ;;  %v698_v13 = vmax.f32 %v579_v5, 0.0  ;;  %v605_v3 = vadd.f32 %v1826_v56, %v1808_v31  ;;  %v613_v53 = vadd.f32 %v1835_v9, %v1806_v30 }
 0x11d   : > { %v747_v14 = vadd.f32 %v746_v8, %v697_v10  ;;  %v705_v8 = vmax.f32 %v597_v50, 0.0  ;;  %v615_v56 = vadd.f32 %v1838_v12, %v1808_v31  ;;  %v623_v9 = vadd.f32 %v1847_v33, %v1806_v30 }
 0x11e   : > { %v784_v15 = vadd.f32 %v783_v11, %v698_v13  ;;  %v582_v17 = vpop.f32.mrb[28].mxu0  ;;  %v1895_v22 = vpop.f32.mrb[28].mxu1  ;;  %v706_v11 = vmax.f32 %v599_v35, 0.0  ;;  %v625_v12 = vadd.f32 %v1850_v37, %v1808_v31  ;;  %v714_v50 = vmax.f32 %v619_v63, 0.0 }
 0x11f   : > { %v583_v18 = vadd.f32 %v582_v17, %v1806_v30  ;;  %v584_v20 = vpop.f32.mrb[29].mxu0  ;;  %v1898_v28 = vpop.f32.mrb[29].mxu1  ;;  %v708_v17 = vmax.f32 %v605_v3, 0.0  ;;  %v633_v33 = vadd.f32 %v1859_v59, %v1806_v30  ;;  %v635_v37 = vadd.f32 %v1862_v0, %v1808_v31 }
 0x120   : > { %v585_v23 = vadd.f32 %v584_v20, %v1808_v31  ;;  %v586_v27 = vpop.f32.mrb[30].mxu0  ;;  %v1903_v42 = vpop.f32.mrb[30].mxu1  ;;  %v709_v20 = vmax.f32 %v607_v41, 0.0  ;;  %v643_v59 = vadd.f32 %v1871_v21, %v1806_v30  ;;  %v645_v0 = vadd.f32 %v1874_v24, %v1808_v31 }
 0x121   : > { %v699_v34 = vmax.f32 %v583_v18, 0.0  ;;  %v587_v36 = vadd.f32 %v586_v27, %v1806_v30  ;;  %v588_v40 = vpop.f32.mrb[31].mxu0  ;;  %v1908_v49 = vpop.f32.mrb[31].mxu1  ;;  %v710_v27 = vmax.f32 %v609_v43, 0.0  ;;  %v719_v3 = vmax.f32 %v633_v33, 0.0 }
 0x122   : > { %v700_v46 = vmax.f32 %v585_v23, 0.0  ;;  %v589_v48 = vadd.f32 %v588_v40, %v1808_v31  ;;  %v712_v40 = vmax.f32 %v615_v56, 0.0  ;;  %v653_v21 = vadd.f32 %v1883_v54, %v1806_v30 }
 0x123   : > { %v748_v51 = vadd.f32 %v747_v14, %v699_v34  ;;  %v701_v52 = vmax.f32 %v587_v36, 0.0  ;;  %v707_v14 = vmax.f32 %v603_v62, 0.0  ;;  %v711_v34 = vmax.f32 %v613_v53, 0.0 }
 0x124   : > { %v785_v55 = vadd.f32 %v784_v15, %v700_v46  ;;  %v702_v57 = vmax.f32 %v589_v48, 0.0  ;;  %v713_v46 = vmax.f32 %v617_v60, 0.0  ;;  %v723_v53 = vmax.f32 %v643_v59, 0.0 }
 0x125   : > { %v749_v38 = vadd.f32 %v748_v51, %v701_v52  ;;  %v715_v52 = vmax.f32 %v623_v9, 0.0  ;;  %v655_v24 = vadd.f32 %v1886_v58, %v1808_v31  ;;  %v665_v54 = vadd.f32 %v1898_v28, %v1808_v31 }
 0x126   : > { %v786_v5 = vadd.f32 %v785_v55, %v702_v57  ;;  %v716_v55 = vmax.f32 %v625_v12, 0.0  ;;  %v727_v63 = vmax.f32 %v653_v21, 0.0  ;;  %v729_v9 = vmax.f32 %v657_v32, 0.0 }
 0x127   : > { %v750_v10 = vadd.f32 %v749_v38, %v703_v61  ;;  %v717_v61 = vmax.f32 %v627_v16, 0.0  ;;  %v718_v38 = vmax.f32 %v629_v19, 0.0  ;;  %v728_v58 = vmax.f32 %v655_v24, 0.0 }
 0x128   : > { %v787_v13 = vadd.f32 %v786_v5, %v704_v1  ;;  %v667_v2 = vadd.f32 %v1903_v42, %v1806_v30  ;;  %v732_v12 = vmax.f32 %v665_v54, 0.0 }
 0x129   : > { %v751_v15 = vadd.f32 %v750_v10, %v705_v8  ;;  %v720_v8 = vmax.f32 %v635_v37, 0.0  ;;  %v1666_v37 = vmov 1966171168  }
 0x12a   : > { %v788_v18 = vadd.f32 %v787_v13, %v706_v11  ;;  %v721_v11 = vmax.f32 %v637_v44, 0.0  ;;  %v722_v13 = vmax.f32 %v639_v47, 0.0  ;;  %v733_v28 = vmax.f32 %v667_v2, 0.0 }
 0x12b   : > { %v752_v23 = vadd.f32 %v751_v15, %v707_v14 }
 0x12c   : > { %v789_v29 = vadd.f32 %v788_v18, %v708_v17  ;;  %v724_v17 = vmax.f32 %v645_v0, 0.0  ;;  %v725_v18 = vmax.f32 %v647_v4, 0.0  ;;  %v847_v0 = vld [vmem:[%s2114_s3] sm:$0xff] (!%p1419_p4)  ;;  %v1667_v4 = vmov (!%p1419_p4), 0.0|0.0  }
 0x12d   : > { %v753_v36 = vadd.f32 %v752_v23, %v709_v20  ;;  %v663_v20 = vadd.f32 %v1895_v22, %v1806_v30  ;;  %v659_v23 = vadd.f32 %v1892_v6, %v1808_v31  ;;  %1530 = vmatprep.subr.bf16.mxu0 (!%p1419_p4), %v1667_v4  ;;  %1536 = vmatprep.subr.bf16.mxu1 (!%p1419_p4), %v1667_v4 }
 0x12e   : > { %v790_v45 = vadd.f32 %v789_v29, %v710_v27 }
 0x12f   : > { %v754_v48 = vadd.f32 %v753_v36, %v711_v34  ;;  %v731_v36 = vmax.f32 %v663_v20, 0.0  ;;  %v730_v22 = vmax.f32 %v659_v23, 0.0  ;;  %v947_v20 = vld [vmem:[%s2116_s5 + $0x18] sm:$0xff] (!%p1419_p4)  ;;  %v1432_v23 = vld [vmem:[%s2116_s5 + $0x48] sm:$0xff] (!%p1419_p4) }
 0x130   : > { %v791_v51 = vadd.f32 %v790_v45, %v712_v40  ;;  %v669_v45 = vadd.f32 %v1908_v49, %v1808_v31 }
 0x131   : > { %v755_v35 = vadd.f32 %v754_v48, %v713_v46 }
 0x132   : > { %v792_v57 = vadd.f32 %v791_v51, %v714_v50  ;;  %v734_v50 = vmax.f32 %v669_v45, 0.0  ;;  %v1425_v45 = vld [vmem:[%s2116_s5 + $0x28] sm:$0xff] (!%p1419_p4) }
 0x133   : > { %v756_v62 = vadd.f32 %v755_v35, %v715_v52 }
 0x134   : > { %v793_v1 = vadd.f32 %v792_v57, %v716_v55  ;;  %v815_v57 = vunpack.c.l.s4 %v1666_v37 }
 0x135   : > { %v757_v5 = vadd.f32 %v756_v62, %v717_v61 }
 0x136   : > { %v794_v41 = vadd.f32 %v793_v1, %v718_v38  ;;  %v816_v44 = vunpack.c.0.s8 %v815_v57 }
 0x137   : > { %v758_v10 = vadd.f32 %v757_v5, %v719_v3 }
 0x138   : > { %v795_v43 = vadd.f32 %v794_v41, %v720_v8  ;;  %v819_v5 = vsub.s32 %v816_v44, %v1799_v26 }
 0x139   : > { %v759_v14 = vadd.f32 %v758_v10, %v721_v11  ;;  %v848_v10 = vld [vmem:[%s2114_s3 + $0x8] sm:$0xff] (!%p1419_p4)  ;;  %v849_v11 = vld [vmem:[%s2114_s3 + $0x10] sm:$0xff] (!%p1419_p4) }
 0x13a   : > { %v796_v15 = vadd.f32 %v795_v43, %v722_v13  ;;  %v1531_v25 = vpack.c.bf16 (!%p1419_p4), %v848_v10, %v847_v0  ;;  %v850_v43 = vld [vmem:[%s2114_s3 + $0x18] sm:$0xff] (!%p1419_p4)  ;;  %v1669_v13 = vmov (!%p1419_p4), 0.0   ;;  %v1677_v0 = vmov (!%p1419_p4), 3  }
 0x13b   : > { %v760_v56 = vadd.f32 %v759_v14, %v723_v53  ;;  %1483 = vmatprep.mubr.msk.f32.mxu0 (!%p1419_p4), %vm1668_vm3, %v1669_v13  ;;  %v956_v14 = vunpack.c.l.s4 (!%p1419_p4), %v1670_v7  ;;  %1494 = vmatprep.mubr.msk.f32.mxu1 (!%p1419_p4), %vm1668_vm3, %v1669_v13  ;;  %v1534_v53 = vpack.c.bf16 (!%p1419_p4), %v850_v43, %v849_v11 }
 0x13c   : > { %v797_v60 = vadd.f32 %v796_v15, %v724_v17  ;;  %1532 = vmatpush3.bf16.msra.mxu0 (!%p1419_p4), %v1531_v25  ;;  %v1429_v25 = vld [vmem:[%s2117_s6 + $0x1] ss:$0 sm:$0xff] (!%p1419_p4) }
 0x13d   : > { %v761_v27 = vadd.f32 %v760_v56, %v725_v18  ;;  %1533 = vmatprep.subr.bf16.mxu0 (!%p1419_p4), %v1667_v4  ;;  %v957_v21 = vunpack.c.0.s8 (!%p1419_p4), %v956_v14  ;;  %v945_v56 = vld [vmem:[%s2116_s5 + $0x8] sm:$0xff] (!%p1419_p4)  ;;  %v946_v18 = vld [vmem:[%s2116_s5 + $0x10] sm:$0xff] (!%p1419_p4) }
 0x13e   : > { %v798_v29 = vadd.f32 %v797_v60, %v726_v39  ;;  %v1540_v60 = vpack.c.bf16 (!%p1419_p4), %v947_v20, %v946_v18  ;;  %v1431_v39 = vld [vmem:[%s2116_s5 + $0x40] sm:$0xff] (!%p1419_p4) }
 0x13f   : > { %v762_v34 = vadd.f32 %v761_v27, %v727_v63  ;;  %v960_v15 = vsub.s32 (!%p1419_p4), %v957_v21, %v1799_v26  ;;  %v944_v26 = vld [vmem:[%s2116_s5] sm:$0xff] (!%p1419_p4)  ;;  %v1549_v54 = vpack.c.bf16 (!%p1419_p4), %v1432_v23, %v1431_v39  ;;  %v1433_v27 = vld [vmem:[%s2116_s5 + $0x50] sm:$0xff] (!%p1419_p4)  ;;  %v1434_v63 = vld [vmem:[%s2116_s5 + $0x58] sm:$0xff] (!%p1419_p4) }
 0x140   : > { %v799_v40 = vadd.f32 %v798_v29, %v728_v58  ;;  %1535 = vmatpush3.bf16.msra.mxu0 (!%p1419_p4), %v1534_v53  ;;  %v1537_v32 = vpack.c.bf16 (!%p1419_p4), %v945_v56, %v944_v26  ;;  %v1552_v58 = vpack.c.bf16 (!%p1419_p4), %v1434_v63, %v1433_v27  ;;  %v1436_v53 = vld [vmem:[%s2117_s6 + $0x2] ss:$0 sm:$0xff] (!%p1419_p4)  ;;  %v1443_v26 = vld [vmem:[%s2117_s6 + $0x3] ss:$0 sm:$0xff] (!%p1419_p4) }
 0x141   : > { %v763_v6 = vadd.f32 %v762_v34, %v729_v9  ;;  %1542 = vmatprep.subr.bf16.mxu0 (!%p1419_p4), %v1667_v4  ;;  %v1420_v9 = vld [vmem:[%s2115_s4] ss:$0 sm:$0xff] (!%p1419_p4) }
 0x142   : > { %v800_v46 = vadd.f32 %v799_v40, %v730_v22  ;;  %1538 = vmatpush3.bf16.msra.mxu1 (!%p1419_p4), %v1537_v32 }
 0x143   : > { %v764_v16 = vadd.f32 %v763_v6, %v731_v36  ;;  %1539 = vmatprep.subr.bf16.mxu1 (!%p1419_p4), %v1667_v4  ;;  %v1426_v6 = vld [vmem:[%s2116_s5 + $0x30] sm:$0xff] (!%p1419_p4) }
 0x144   : > { %v801_v48 = vadd.f32 %v800_v46, %v732_v12  ;;  %v1424_v12 = vld [vmem:[%s2116_s5 + $0x20] sm:$0xff] (!%p1419_p4) }
 0x145   : > { %v765_v19 = vadd.f32 %v764_v16, %v733_v28  ;;  %v1543_v46 = vpack.c.bf16 (!%p1419_p4), %v1425_v45, %v1424_v12  ;;  %v1427_v16 = vld [vmem:[%s2116_s5 + $0x38] sm:$0xff] (!%p1419_p4) }
 0x146   : > { %v802_v51 = vadd.f32 %v801_v48, %v734_v50  ;;  %1541 = vmatpush3.bf16.msra.mxu1 (!%p1419_p4), %v1540_v60  ;;  %v1546_v28 = vpack.c.bf16 (!%p1419_p4), %v1427_v16, %v1426_v6  ;;  %v1438_v48 = vld [vmem:[%s2116_s5 + $0x60] sm:$0xff] (!%p1419_p4)  ;;  %v1439_v50 = vld [vmem:[%s2116_s5 + $0x68] sm:$0xff] (!%p1419_p4) }
 0x147   : > { %v766_v52 = vrot.slane %v765_v19, 4  ;;  %1548 = vmatprep.subr.bf16.mxu1 (!%p1419_p4), %v1667_v4 }
 0x148   : > { %v803_v33 = vrot.slane %v802_v51, 4 }
 0x149   : > { %v767_v35 = vadd.f32 %v766_v52, %v765_v19  ;;  %v1440_v52 = vld [vmem:[%s2116_s5 + $0x70] sm:$0xff] (!%p1419_p4) }
 0x14a   : > { %v804_v30 = vadd.f32 %v803_v33, %v802_v51  ;;  %v1555_v51 = vpack.c.bf16 (!%p1419_p4), %v1439_v50, %v1438_v48  ;;  %v1441_v33 = vld [vmem:[%s2116_s5 + $0x78] sm:$0xff] (!%p1419_p4) }
 0x14b   : > { %v768_v42 = vrot.slane %v767_v35, 2 }
 0x14c   : > { %v805_v55 = vrot.slane %v804_v30, 2 }
 0x14d   : > { %v769_v61 = vadd.f32 %v768_v42, %v767_v35  ;;  %v1558_v35 = vpack.c.bf16 (!%p1419_p4), %v1441_v33, %v1440_v52 }
 0x14e   : > { %v806_v31 = vadd.f32 %v805_v55, %v804_v30 }
 0x14f   : > { %v770_v49 = vrot.slane %v769_v61, 1 }
 0x150   : > { %v807_v62 = vrot.slane %v806_v31, 1 }
 0x151   : > { %v771_v38 = vadd.f32 %v770_v49, %v769_v61 }
 0x152   : > { %v808_v1 = vadd.f32 %v807_v62, %v806_v31 }
 0x153   : > { %v809_v47 = vmul.f32 0.00390625, %v771_v38  ;;  %v1674_v38 = vmov (!%p1419_p4), 1  }
 0x154   : > { %v810_v3 = vmul.f32 0.00390625, %v808_v1  ;;  %1619 = vset.pattern.permute.xlu1 (!%p1419_p4), %v1674_v38  ;;  %v1675_v1 = vmov (!%p1419_p4), 0  }
 0x155   : > { %1618 = vset.pattern.permute.xlu0 (!%p1419_p4), %v1675_v1 }
 0x156   : > { %v813_v59 = vcombine.low %v809_v47, %v810_v3  ;;  %845 = sbr.rel (%p1419_p4) target bundleno = 1027 (0x403), region = 52 }
 0x158   : > { %v820_v8 = vrot.slane %v813_v59, %v819_v5 }
 0x15a   : > { %v827_v41 = vrot.slane %v820_v8, %v819_v5 }
 0x15c   : > { %841 = vst.msk [vmem:[%s840_s26] ss:$2 sm:$0x3] %vm831_vm2, %v827_v41  ;;  %v1676_v41 = vmov (!%p1419_p4), 2  }
 0x163   : > { %v846_v17 = vld [vmem:[#allocation2] sm:$0xf] }
 0x164   : > { %v1995_v24 = vrot.slane %v846_v17, %v960_v15  ;;  %1484 = vmatmul.mubr.msk.f32.vlgmr.msra.gmra.mrb[0].mxu0 %vm858_vm4, %v846_v17 }
 0x165   : > { %1505 = vmatprep.mubr.msk.f32.mxu0 %vm1668_vm3, %v1669_v13  ;;  %1544 = vmatpush3.bf16.msra.mxu0 %v1543_v46 }
 0x166   : > { %962 = vrot.lane.b32.xlu0 %v1995_v24, %s1671_s12  ;;  %1149 = vrot.lane.b32.xlu1 %v1995_v24, %s1672_s13  ;;  %v1242_v30 = vcombine.high %v1995_v24, %v1995_v24 }
 0x167   : > { %1545 = vmatprep.subr.bf16.mxu0 %v1667_v4 }
 0x169   : > { %1547 = vmatpush3.bf16.msra.mxu0 %v1546_v28 }
 0x16a   : > { %1056 = vrot.lane.b32.xlu0 %v1995_v24, %s1673_s22  ;;  %1554 = vmatprep.subr.bf16.mxu0 %v1667_v4 }
 0x1d8   : > { %v963_v29 = vpop.permute.xlu0 %962  ;;  %v1150_v34 = vpop.permute.xlu1 %1149 }
 0x1d9   : > { %1495 = vmatmul.mubr.msk.f32.vlgmr.msra.gmra.mrb[0].mxu1 %vm858_vm4, %v963_v29 }
 0x1da   : > { %1550 = vmatpush3.bf16.msra.mxu1 %v1549_v54  ;;  %1516 = vmatprep.mubr.msk.f32.mxu1 %vm1668_vm3, %v1669_v13 }
 0x1db   : > { %1551 = vmatprep.subr.bf16.mxu1 %v1667_v4 }
 0x1dc   : > { %v1057_v19 = vpop.permute.xlu0 %1056 }
 0x1dd   : > { %1506 = vmatmul.mubr.msk.f32.vlgmr.msra.gmra.mrb[2].mxu0 %vm858_vm4, %v1057_v19 }
 0x1de   : > { %1553 = vmatpush3.bf16.msra.mxu1 %v1552_v58  ;;  %1556 = vmatpush3.bf16.msra.mxu0 %v1555_v51 }
 0x1df   : > { %1527 = vmatprep.mubr.msk.f32.mxu0 %vm1668_vm3, %v1669_v13  ;;  %1557 = vmatprep.subr.bf16.mxu0 %v1667_v4  ;;  %v1422_v4 = vld [vmem:[%s2117_s6] ss:$0 sm:$0xff] }
 0x1e1   : > { %1517 = vmatmul.mubr.msk.f32.vlgmr.msra.gmra.mrb[2].mxu1 %vm858_vm4, %v1150_v34 }
 0x1e2   : > { %1559 = vmatpush3.bf16.msra.mxu0 %v1558_v35 }
 0x1e5   : > { %1528 = vmatmul.mubr.msk.f32.vlgmr.msra.gmra.mrb[4].mxu0 %vm858_vm4, %v1242_v30 }
 0x237   : > { %v928_v36 = vpop.f32.mrb[0].mxu0 }
 0x238   : > { %v929_v2 = vadd.f32 %v1420_v9, %v928_v36  ;;  %v1485_v40 = vpop.f32.mrb[1].mxu0 }
 0x23a   : > { %v933_v22 = vsel %vm932_vm5, %v929_v2, -inf }
 0x23b   : > { %934 = vmax.xlane.f32.xlu1 %v933_v22 }
 0x2ac   : > { %v1032_v42 = vpop.f32.mrb[0].mxu1 }
 0x2ad   : > { %v1496_v55 = vpop.f32.mrb[1].mxu1  ;;  %v1033_v43 = vadd.f32 %v1422_v4, %v1032_v42 }
 0x2b0   : > { %v1126_v47 = vpop.f32.mrb[2].mxu0 }
 0x2b1   : > { %v1507_v3 = vpop.f32.mrb[3].mxu0  ;;  %v1127_v13 = vadd.f32 %v1429_v25, %v1126_v47 }
 0x2b4   : > { %v1219_v37 = vpop.f32.mrb[2].mxu1 }
 0x2b5   : > { %v1518_v57 = vpop.f32.mrb[3].mxu1  ;;  %v1220_v24 = vadd.f32 %v1436_v53, %v1219_v37 }
 0x2b8   : > { %v1311_v10 = vpop.f32.mrb[4].mxu0 }
 0x2b9   : > { %v1529_v11 = vpop.f32.mrb[5].mxu0  ;;  %v1312_v32 = vadd.f32 %v1443_v26, %v1311_v10 }
 0x2c8   : > { %v935_v61 = vpop.xlane.xlu1 %934 }
 0x2c9   : > { %v936_v31 = vsub.f32 %v929_v2, %v935_v61 }
 0x2cb   : > { %v937_v49 = vmul.f32 1.442695, %v936_v31 }
 0x2cd   : > { %1623 = vpow2.f32 %v937_v49 }
 0x2d7   : > { %v1624_v62 = vpop.eup %1623 }
 0x2d8   : > { %v939_v44 = vsel %vm932_vm5, %v1624_v62, 0.0 }
 0x2d9   : > { %940 = vadd.xlane.f32.xlu0 %v939_v44 }
 0x366   : > { %v941_v5 = vpop.xlane.xlu0 %940 }
 0x367   : > { %1625 = vrcp.f32 %v941_v5 }
 0x371   : > { %v1626_v59 = vpop.eup %1625 }
 0x372   : > { %v943_v8 = vmul.f32 %v1626_v59, %v1624_v62 }
 0x374   : > { %1131 = vperm.xlu1 %1619, %v943_v8   ;;  %1038 = vperm.xlu0 %1618, %v943_v8  }
 0x378   : > { %1620 = vset.pattern.permute.xlu1 %v1676_v41  ;;  %1622 = vset.pattern.permute.xlu0 %v1677_v0 }
 0x379   : > { %1224 = vperm.xlu1 %1620, %v943_v8  }
 0x37d   : > { %1621 = vset.pattern.permute.xlu1 %v1677_v0 }
 0x37e   : > { %1316 = vperm.xlu1 %1621, %v943_v8  }
 0x3f3   : > { %v1132_v7 = vpop.permute.xlu1 %1131  ;;  %v1039_v14 = vpop.permute.xlu0 %1038 }
 0x3f4   : > { %v1134_v21 = vmul.f32 %v1132_v7, %v1127_v13  ;;  %v1041_v15 = vmul.f32 %v1039_v14, %v1033_v43 }
 0x3f6   : > { %v1135_v17 = vadd.f32 %v1134_v21, %v1041_v15 }
 0x3f8   : > { %v1225_v56 = vpop.permute.xlu1 %1224 }
 0x3f9   : > { %v1227_v18 = vmul.f32 %v1225_v56, %v1220_v24 }
 0x3fb   : > { %v1228_v20 = vadd.f32 %v1227_v18, %v1135_v17 }
 0x3fd   : > { %v1317_v60 = vpop.permute.xlu1 %1316 }
 0x3fe   : > { %v1319_v39 = vmul.f32 %v1317_v60, %v1312_v32 }
 0x400   : > { %v1320_v23 = vadd.f32 %v1319_v39, %v1228_v20 }
 0x402   : > { %1322 = vst.msk [vmem:[#allocation3] sm:$0x3] %vm1321_vm6, %v1320_v23 }
 0x403 PF: > { %p1570_p5 = scmp.eq.s32.totalorder %s1725_s25, 1  ;;  %s1678_s15 = smov [#allocation3]  }
 0x404   : > { %s1330_s16 = sshll.u32 %s1678_s15, 4  ;;  %s1331_s16 = int_to_ptr.vmem [resolvable:$true] %s1330_s16 }
 0x405   : > { %s1627_s17 = scalar_lea.vmem %s1331_s16, 32  ;;  %p1634_p9 = scmp.lt.s32.totalorder %s1331_s16, %s1331_s16 }
 0x406   : > { %p1628_p6 = scmp.ne.s32.totalorder %s1331_s16, %s1627_s17  ;;  %p1635_p10 = scmp.lt.s32.totalorder %s1627_s17, %s1627_s17 }
 0x408   : > { %p1629_p7 = pnand %p1628_p6, %p1570_p5  ;;  %p1636_p11 = por %p1635_p10, %p1634_p9 }
 0x40a   : > { %p1630_p8 = pneg %p1629_p7 }
 0x40c   : > { %p1637_p12 = pnand %p1636_p11, %p1630_p8 }
 0x40e   : > { %1640 = shalt.err (!%p1637_p12)
}
 0x40f   : > { %s1641_s20 = scalar_lea.hbm %s2118_s7, 32 }
 0x410   : > { %p1642_p13 = scmp.ne.s32.totalorder %s2118_s7, %s1641_s20  ;;  %p1647_p2 = scmp.lt.u32.totalorder %s1641_s20, %s2118_s7 }
 0x412   : > { %p1643_p0 = pnand %p1642_p13, %p1570_p5 }
 0x414   : > { %p1644_p1 = pneg %p1643_p0 }
 0x416   : > { %p1649_p3 = pnand %p1647_p2, %p1644_p1 }
 0x418   : > { %1652 = shalt.err (!%p1649_p3)
}
 0x419   : > { %1567 = dma.vmem_to_hbm [thread:$0]  (%p1570_p5), %s1331_s16, 32, %s2118_s7, [#allocation4]  }
 0x41a   : > { %1658 = dma.done.wait (%p1570_p5), [#allocation4], 32  }
 0x41b   : > { %1660 = vsyncadd (%p1570_p5), [#allocation4], 4294967264 }
 0x41c PF: > { %s18_s24 = sadd.s32 1, %s1663_s24  }
 0x41d   : > { %p15_p4 = scmp.ge.s32.totalorder %s18_s24, 4  }
 0x41f   :  { %17 = sbr.rel (!%p15_p4) target bundleno = 1 (0x1), region = 86 }
 0x426   :  { %1343 = vsyncpa [#allocation4], 1 }
 0x427   :  { %1345 = vsyncpa [#allocation4 + $0x1], 1 }

</bundles_post_ra>
